<compile_context>
chip_gen: v7x
topology: tpu7x:2x2x1
jax: 0.10.0
libtpu: 0.0.40
codegen_flags: <defaults>
</compile_context>

<pallas_src>
import numpy as np
import jax
import jax.numpy as jnp
from jax.experimental import pallas as pl
from jax.experimental.pallas import tpu as pltpu

INPUT_DIM = 512
EMB_DIM = 128
HIDDEN_DIM = 128
N_LAYERS = 2


# ----------------------------- Pallas kernels ------------------------------

def _linear_kernel(x_ref, w_ref, b_ref, o_ref):
    x = x_ref[...].astype(jnp.bfloat16)
    y = jnp.dot(x, w_ref[...], preferred_element_type=jnp.float32) + b_ref[...]
    o_ref[...] = y.astype(o_ref.dtype)


def linear(x, w, b, out_dtype=jnp.float32, block_m=1024):
    """y = x @ w + b.  bf16 MXU operands, f32 accumulate, out_dtype output."""
    M, K = x.shape
    N = w.shape[1]
    b2 = b.reshape(1, N).astype(jnp.float32)
    if M <= block_m:
        # Small M: single invocation, everything resident in VMEM.
        return pl.pallas_call(
            _linear_kernel,
            out_shape=jax.ShapeDtypeStruct((M, N), out_dtype),
            in_specs=[pl.BlockSpec(memory_space=pltpu.MemorySpace.VMEM)] * 3,
            out_specs=pl.BlockSpec(memory_space=pltpu.MemorySpace.VMEM),
        )(x, w, b2)
    # Large M: row tiles ("parallel" grid -> megacore sharding).  The ragged
    # last block is masked by Pallas -> no host-side jnp.pad copy of x.
    out_bytes = jnp.dtype(out_dtype).itemsize
    vmem_limit = int(min(
        2 * block_m * (K * x.dtype.itemsize + N * out_bytes)   # double-buffered tiles
        + K * N * 2 + (8 << 20),
        64 << 20))
    return pl.pallas_call(
        _linear_kernel,
        out_shape=jax.ShapeDtypeStruct((M, N), out_dtype),
        grid=(pl.cdiv(M, block_m),),
        in_specs=[
            pl.BlockSpec((block_m, K), lambda i: (i, 0)),
            pl.BlockSpec((K, N), lambda i: (0, 0)),
            pl.BlockSpec((1, N), lambda i: (0, 0)),
        ],
        out_specs=pl.BlockSpec((block_m, N), lambda i: (i, 0)),
        compiler_params=pltpu.CompilerParams(
            dimension_semantics=("parallel",), vmem_limit_bytes=vmem_limit),
    )(x, w, b2)


def _bilstm_kernel(x_ref, wxf_ref, wxb_ref, whf_ref, whb_ref, bf_ref, bb_ref,
                   o_ref, h_scr, c_scr):
    """Fused bidirectional LSTM layer: per-step input projection + recurrence.

    x_ref  : (T, B, Din) bf16  layer input, VMEM resident (no xg intermediate)
    wx*_ref: (Din, 4H)   bf16  input->gate weights per direction, cols [i|f|g|o]
    wh*_ref: (H, 4H)     bf16  hidden->gate weights per direction
    b*_ref : (1, 4H)     f32   fused b_ih + b_hh per direction
    o_ref  : (T, B, 2H)  bf16  [h_fwd | h_bwd] per timestep (position-aligned)
    h_scr  : (B, 2H)     bf16  recurrent h state [h_f | h_b]
    c_scr  : (B, 2H)     f32   recurrent c state [c_f | c_b]
    """
    T, B, _ = x_ref.shape
    H2 = o_ref.shape[-1]
    H = H2 // 2

    h_scr[...] = jnp.zeros_like(h_scr)
    c_scr[...] = jnp.zeros_like(c_scr)

    # Loop-invariant bias broadcast, hoisted out of the recurrence.
    bias_f = jnp.broadcast_to(bf_ref[...], (B, 4 * H))
    bias_b = jnp.broadcast_to(bb_ref[...], (B, 4 * H))

    def cell(gates, c_prev):
        i = jax.nn.sigmoid(gates[:, 0 * H:1 * H])     # PyTorch gate order i,f,g,o
        f = jax.nn.sigmoid(gates[:, 1 * H:2 * H])
        g = jnp.tanh(gates[:, 2 * H:3 * H])
        o = jax.nn.sigmoid(gates[:, 3 * H:4 * H])
        c = f * c_prev + i * g                        # f32 state
        h = o * jnp.tanh(c)
        return h, c

    def step(t, carry):
        tr = T - 1 - t
        x_t = x_ref[t]                                # (B, Din) forward stream
        x_r = x_ref[tr]                               # (B, Din) backward stream
        h_prev = h_scr[...]                           # (B, 2H) bf16

        gates_f = (jnp.dot(x_t, wxf_ref[...], preferred_element_type=jnp.float32)
                   + jnp.dot(h_prev[:, 0:H], whf_ref[...],
                             preferred_element_type=jnp.float32)
                   + bias_f)
        gates_b = (jnp.dot(x_r, wxb_ref[...], preferred_element_type=jnp.float32)
                   + jnp.dot(h_prev[:, H:H2], whb_ref[...],
                             preferred_element_type=jnp.float32)
                   + bias_b)

        h_f, c_f = cell(gates_f, c_scr[:, 0:H])
        h_b, c_b = cell(gates_b, c_scr[:, H:H2])

        c_scr[:, 0:H] = c_f
        c_scr[:, H:H2] = c_b
        hf16 = h_f.astype(jnp.bfloat16)
        hb16 = h_b.astype(jnp.bfloat16)
        h_scr[:, 0:H] = hf16
        h_scr[:, H:H2] = hb16
        o_ref[t, :, 0:H] = hf16                       # forward hidden for position t
        o_ref[tr, :, H:H2] = hb16                     # backward hidden for position T-1-t
        return carry

    jax.lax.fori_loop(0, T, step, 0)


def bilstm(x, lp):
    """x: (T, B, Din) bf16 -> (T, B, 2H) bf16 = concat(h_fwd, h_bwd) per timestep."""
    T, B, Din = x.shape
    H = HIDDEN_DIM
    H2 = 2 * H
    args = (x, lp["w_x_f"], lp["w_x_b"], lp["w_h_f"], lp["w_h_b"], lp["b_f"], lp["b_b"])

    resident = (sum(int(a.size) * a.dtype.itemsize for a in args)
                + T * B * H2 * 2                      # bf16 output
                + B * H2 * (2 + 4))                   # h (bf16) + c (f32) scratch
    vmem_limit = int(min(resident * 1.25 + (8 << 20), 64 << 20))

    # Use both TensorCores (v7x) for the recurrence when the batch is large
    # enough: split it in half over a "parallel" grid axis.  A split only adds
    # serial steps on single-TC chips / tiny batches, so keep one block there.
    n_split = 2 if (B >= 32 and B % 32 == 0) else 1
    Bc = B // n_split
    scratch = [pltpu.VMEM((Bc, H2), jnp.bfloat16),    # h state [fwd | bwd]
               pltpu.VMEM((Bc, H2), jnp.float32)]     # c state [fwd | bwd]

    if n_split == 1:
        return pl.pallas_call(
            _bilstm_kernel,
            out_shape=jax.ShapeDtypeStruct((T, B, H2), jnp.bfloat16),
            in_specs=[pl.BlockSpec(memory_space=pltpu.MemorySpace.VMEM)] * 7,
            out_specs=pl.BlockSpec(memory_space=pltpu.MemorySpace.VMEM),
            scratch_shapes=scratch,
            compiler_params=pltpu.CompilerParams(vmem_limit_bytes=vmem_limit),
        )(*args)

    return pl.pallas_call(
        _bilstm_kernel,
        out_shape=jax.ShapeDtypeStruct((T, B, H2), jnp.bfloat16),
        grid=(n_split,),
        in_specs=[
            pl.BlockSpec((T, Bc, Din), lambda i: (0, i, 0)),
            pl.BlockSpec((Din, 4 * H), lambda i: (0, 0)),
            pl.BlockSpec((Din, 4 * H), lambda i: (0, 0)),
            pl.BlockSpec((H, 4 * H), lambda i: (0, 0)),
            pl.BlockSpec((H, 4 * H), lambda i: (0, 0)),
            pl.BlockSpec((1, 4 * H), lambda i: (0, 0)),
            pl.BlockSpec((1, 4 * H), lambda i: (0, 0)),
        ],
        out_specs=pl.BlockSpec((T, Bc, H2), lambda i: (0, i, 0)),
        scratch_shapes=scratch,
        compiler_params=pltpu.CompilerParams(
            dimension_semantics=("parallel",), vmem_limit_bytes=vmem_limit),
    )(*args)


# ------------------------------ parameters ---------------------------------

def init_params(key, n_class):
    """Parameters in the original PyTorch layout."""
    n_token = n_class + 3
    keys = iter(jax.random.split(key, 64))

    def rnd(shape, scale=0.05):
        return jax.random.normal(next(keys), shape, jnp.float32) * scale

    params = {
        "embedding": rnd((n_token, EMB_DIM)),
        "fc_in_w": rnd((EMB_DIM, INPUT_DIM)),          # PyTorch Linear: (out, in)
        "fc_in_b": rnd((EMB_DIM,)),
        "fc_out_w": rnd((n_class, 2 * HIDDEN_DIM)),
        "fc_out_b": rnd((n_class,)),
        "lstm": [],
    }
    for layer in range(N_LAYERS):
        din = EMB_DIM if layer == 0 else 2 * HIDDEN_DIM
        layer_p = []
        for _direction in range(2):                    # fwd, reverse
            layer_p.append({
                "w_ih": rnd((4 * HIDDEN_DIM, din)),
                "w_hh": rnd((4 * HIDDEN_DIM, HIDDEN_DIM)),
                "b_ih": rnd((4 * HIDDEN_DIM,)),
                "b_hh": rnd((4 * HIDDEN_DIM,)),
            })
        params["lstm"].append(layer_p)
    return params


def prepare_params(params, n_class):
    """One-time conversion to kernel-friendly layout (at init, not per call)."""
    H = HIDDEN_DIM
    n_pad = ((n_class + 127) // 128) * 128            # fc_out lane-dense width
    pp = {
        "embedding": params["embedding"].astype(jnp.bfloat16),
        "fc_in_w": params["fc_in_w"].T.astype(jnp.bfloat16),          # (512, 128)
        "fc_in_b": params["fc_in_b"].astype(jnp.float32),
        "fc_out_w": jnp.pad(params["fc_out_w"].T,
                            ((0, 0), (0, n_pad - n_class))).astype(jnp.bfloat16),
        "fc_out_b": jnp.pad(params["fc_out_b"],
                            (0, n_pad - n_class)).astype(jnp.float32),
        "lstm": [],
    }
    for pf, pb in params["lstm"]:
        pp["lstm"].append({
            "w_x_f": pf["w_ih"].T.astype(jnp.bfloat16),               # (Din, 4H)
            "w_x_b": pb["w_ih"].T.astype(jnp.bfloat16),
            "w_h_f": pf["w_hh"].T.astype(jnp.bfloat16),               # (H, 4H)
            "w_h_b": pb["w_hh"].T.astype(jnp.bfloat16),
            "b_f": (pf["b_ih"] + pf["b_hh"]).reshape(1, 4 * H).astype(jnp.float32),
            "b_b": (pb["b_ih"] + pb["b_hh"]).reshape(1, 4 * H).astype(jnp.float32),
        })
    return pp


# ------------------------------- forward -----------------------------------

def sentence_encoder_forward(pp, src_feat, src_len, n_class):
    """src_feat: (sum(src_len), 512) backbone features.  src_len: python list of ints."""
    H = HIDDEN_DIM
    n_token = n_class + 3
    B = len(src_len)
    max_len = max(src_len)
    T = max_len + 2
    sum_len = sum(src_len)

    # Batch padded to a multiple of 16 (bf16 sublane packing) so every (B,*)
    # load/store in the recurrence is an unmasked full-tile access; multiples
    # of 32 additionally enable the 2-way TensorCore split in `bilstm`.
    B_pad = ((B + 15) // 16) * 16
    if B_pad >= 32:
        B_pad = ((B_pad + 31) // 32) * 32

    # fc_in on backbone features, emitted directly in bf16 (next consumer is
    # the bf16 MXU of LSTM layer 0).
    feats = linear(src_feat, pp["fc_in_w"], pp["fc_in_b"], out_dtype=jnp.bfloat16)

    # Row table [features | <start> | <end> | <null>]; one static gather
    # replaces the per-sequence python padding loop (time-major directly).
    # Padded nn.LSTM semantics (the reference feeds a dense padded batch, no
    # pack_padded_sequence), so <null> positions flow through the backward
    # direction exactly as in the reference.
    emb = pp["embedding"]
    table = jnp.concatenate(
        [feats, emb[n_token - 3][None], emb[n_token - 2][None], emb[n_token - 1][None]],
        axis=0)
    START, END, NULL = sum_len, sum_len + 1, sum_len + 2
    idx = np.full((T, B_pad), NULL, np.int32)
    cur = 0
    for b, l in enumerate(src_len):
        idx[0, b] = START
        idx[1:1 + l, b] = np.arange(cur, cur + l, dtype=np.int32)
        idx[1 + l, b] = END
        cur += l
    x = table[jnp.asarray(idx)]                                       # (T, B_pad, 128) bf16

    # 2-layer bidirectional LSTM (nn.LSTM inter-layer dropout is training-only
    # -> inference semantics, no dropout).  The per-layer input projection is
    # fused into the recurrence kernel: no (T,B,8H) intermediate exists.
    for lp in pp["lstm"]:
        x = bilstm(x, lp)                                             # (T, B_pad, 2H) bf16

    # fc_out with lane-dense (128-padded) output width.
    logits = linear(x.reshape(T * B_pad, 2 * H), pp["fc_out_w"], pp["fc_out_b"])

    # unroll: keep positions 1..l of every sequence -> one static gather.
    un_idx = np.concatenate(
        [(1 + np.arange(l, dtype=np.int32)) * B_pad + b for b, l in enumerate(src_len)])
    return logits[jnp.asarray(un_idx), :n_class]                      # (sum_len, n_class)


if __name__ == "__main__":
    n_class = 10
    src_len = [5, 3]
    key = jax.random.PRNGKey(0)
    kp, kx = jax.random.split(key)
    params = init_params(kp, n_class)
    prepped = prepare_params(params, n_class)
    src_feat = jax.random.normal(kx, (sum(src_len), INPUT_DIM), jnp.float32)

    out = sentence_encoder_forward(prepped, src_feat, src_len, n_class)
    out = jax.block_until_ready(out)
    assert out.shape == (sum(src_len), n_class), out.shape
    assert bool(jnp.all(jnp.isfinite(out)))
    print("KERNEL_OK")
</pallas_src>

<mosaic_0001>
module attributes {stable_mosaic.version = 11 : i64} {
  func.func @_linear_kernel(%arg0: memref<8x512xf32, #tpu.memory_space<vmem>>, %arg1: memref<512x128xbf16, #tpu.memory_space<vmem>>, %arg2: memref<1x128xf32, #tpu.memory_space<vmem>>, %arg3: memref<8x128xbf16, #tpu.memory_space<vmem>>) attributes {dimension_semantics = [], scalar_prefetch = 0 : i64, scratch_operands = 0 : i64, tpu.core_type = #tpu.core_type<tc>} {
    %c0 = arith.constant 0 : index
    %c0_0 = arith.constant 0 : index
    %0 = vector.load %arg0[%c0, %c0_0] : memref<8x512xf32, #tpu.memory_space<vmem>>, vector<8x512xf32>
    %1 = arith.truncf %0 : vector<8x512xf32> to vector<8x512xbf16>
    %c0_1 = arith.constant 0 : index
    %c0_2 = arith.constant 0 : index
    %2 = vector.load %arg1[%c0_1, %c0_2] : memref<512x128xbf16, #tpu.memory_space<vmem>>, vector<512x128xbf16>
    %cst = arith.constant dense<0.000000e+00> : vector<8x128xf32>
    %3 = tpu.matmul %1, %2, %cst {dimension_numbers = #tpu.dot_dimension_numbers<[1], [0], [0], [1], [0, 0, 1, 1], [], []>} : vector<8x512xbf16>, vector<512x128xbf16>, vector<8x128xf32> -> vector<8x128xf32>
    %c0_3 = arith.constant 0 : index
    %c0_4 = arith.constant 0 : index
    %4 = vector.load %arg2[%c0_3, %c0_4] : memref<1x128xf32, #tpu.memory_space<vmem>>, vector<1x128xf32>
    %5 = vector.broadcast %4 : vector<1x128xf32> to vector<8x128xf32>
    %6 = arith.addf %3, %5 : vector<8x128xf32>
    %7 = arith.truncf %6 : vector<8x128xf32> to vector<8x128xbf16>
    %c0_5 = arith.constant 0 : index
    %c0_6 = arith.constant 0 : index
    %8 = vector.load %arg3[%c0_5, %c0_6] : memref<8x128xbf16, #tpu.memory_space<vmem>>, vector<8x128xbf16>
    tpu.vector_store %arg3[%c0_5, %c0_6], %7 {strides = array<i32>} : memref<8x128xbf16, #tpu.memory_space<vmem>>, vector<8x128xbf16>,
    return
  }
}

</mosaic_0001>

<bundles_post_ra>
// kernel: tpu_custom_call.1
= control target key start
LH: loop header
LB: loop body
LE: loop exit
PB: predicated region body
PF: predicated region fallthrough
CT: control target
= control target key end

     0   :  { %8 = vsyncpa [#allocation3], 0  ;;  %s668_s0 = inlined_call_operand.hbm [shape: f32[8,512], index: 0, kind: input, shape index: {}]   ;;  %s669_s1 = inlined_call_operand.hbm [shape: bf16[512,128], index: 1, kind: input, shape index: {}]   ;;  %s670_s2 = inlined_call_operand.vmem [shape: f32[1,128], index: 2, kind: input, shape index: {}]   ;;  %s671_s3 = inlined_call_operand.hbm [shape: bf16[8,128], index: 3, kind: output, shape index: {}]  }
   0x1   :  { %9 = vsyncpa [#allocation6], 0 }
   0x2   :  { %10 = vsyncpa [#allocation4], 0  ;;  %s597_s12 = smov [#allocation2]   ;;  %s598_s14 = smov [#allocation5]  }
   0x3   :  { %s17_s13 = sshll.u32 %s597_s12, 4  ;;  %s26_s15 = sshll.u32 %s598_s14, 4  ;;  %s18_s13 = int_to_ptr.vmem [resolvable:$true] %s17_s13  ;;  %s622_s15 = int_to_ptr.vmem [resolvable:$true] %s26_s15 }
   0x4   :  { %s525_s18 = scalar_lea.hbm %s668_s0, 512 }
   0x5   :  { %p526_p0 = scmp.ne.s32.totalorder %s668_s0, %s525_s18  ;;  %p529_p1 = scmp.lt.u32.totalorder %s525_s18, %s668_s0 }
   0x7   :  { %p531_p2 = pnand %p529_p1, %p526_p0 }
   0x9   :  { %534 = shalt.err (!%p531_p2)
}
   0xa   :  { %s535_s23 = scalar_lea.vmem %s18_s13, 512  ;;  %p540_p4 = scmp.lt.s32.totalorder %s18_s13, %s18_s13 }
   0xb   :  { %p536_p3 = scmp.ne.s32.totalorder %s18_s13, %s535_s23  ;;  %p541_p5 = scmp.lt.s32.totalorder %s535_s23, %s535_s23 }
   0xd   :  { %p542_p6 = por %p541_p5, %p540_p4 }
   0xf   :  { %p543_p7 = pnand %p542_p6, %p536_p3 }
  0x11   :  { %546 = shalt.err (!%p543_p7)
}
  0x12   :  { %20 = dma.hbm_to_vmem [thread:$0]  %s668_s0, 512, %s18_s13, [#allocation3]  }
  0x13   :  { %s547_s28 = scalar_lea.hbm %s669_s1, 4096 }
  0x14   :  { %p548_p8 = scmp.ne.s32.totalorder %s669_s1, %s547_s28  ;;  %p551_p9 = scmp.lt.u32.totalorder %s547_s28, %s669_s1 }
  0x16   :  { %p553_p10 = pnand %p551_p9, %p548_p8 }
  0x18   :  { %556 = shalt.err (!%p553_p10)
}
  0x19   :  { %s557_s6 = scalar_lea.vmem %s622_s15, 4096  ;;  %p562_p12 = scmp.lt.s32.totalorder %s622_s15, %s622_s15 }
  0x1a   :  { %p558_p11 = scmp.ne.s32.totalorder %s622_s15, %s557_s6  ;;  %p563_p13 = scmp.lt.s32.totalorder %s557_s6, %s557_s6 }
  0x1c   :  { %p564_p0 = por %p563_p13, %p562_p12 }
  0x1e   :  { %p565_p1 = pnand %p564_p0, %p558_p11 }
  0x20   :  { %568 = shalt.err (!%p565_p1)
}
  0x21   :  { %s599_s0 = smov 64   ;;  %s600_s7 = smov 4  }
  0x22   :  { %32 = dma.hbm_to_vmem [thread:$0]  %s669_s1, 4096, %s622_s15, [#allocation6], %s599_s0, %s599_s0, %s600_s7  }
  0x23   :  { %591 = dma.done.wait [#allocation3], 512  }
  0x24   :  { %592 = vsyncadd [#allocation3], 4294966784 }
  0x25   :  { %593 = dma.done.wait [#allocation6], 4096  }
  0x26   :  { %594 = vsyncadd [#allocation6], 4294963200  ;;  %v493_v0 = vld [vmem:[#allocation5 + $0x40] sm:$0xff]   ;;  %v497_v4 = vld [vmem:[#allocation5 + $0x48] sm:$0xff]   ;;  %s601_s11 = smov [#allocation7]  }
  0x27   :  { %v494_v1 = vld [vmem:[#allocation5 + $0xc0] sm:$0xff]   ;;  %444 = vmatprep.subr.bf16.mxu0 %v493_v0  ;;  %v498_v5 = vld [vmem:[#allocation5 + $0xc8] sm:$0xff]   ;;  %v501_v8 = vld [vmem:[#allocation5 + $0x50] sm:$0xff]   ;;  %s401_s12 = sshll.u32 %s601_s11, 4  ;;  %s402_s12 = int_to_ptr.vmem [resolvable:$true] %s401_s12 }
  0x28   :  { %v495_v2 = vld [vmem:[#allocation5] sm:$0xff]   ;;  %466 = vmatprep.subr.bf16.mxu1 %v494_v1  ;;  %v499_v6 = vld [vmem:[#allocation5 + $0x8] sm:$0xff]   ;;  %v502_v9 = vld [vmem:[#allocation5 + $0xd0] sm:$0xff]   ;;  %s569_s13 = scalar_lea.vmem %s402_s12, 64  ;;  %p574_p3 = scmp.lt.s32.totalorder %s402_s12, %s402_s12 }
  0x29   :  { %v496_v3 = vld [vmem:[#allocation5 + $0x80] sm:$0xff]   ;;  %445 = vmatpush3.bf16.msra.mxu0 %v495_v2  ;;  %v500_v7 = vld [vmem:[#allocation5 + $0x88] sm:$0xff]   ;;  %v503_v10 = vld [vmem:[#allocation5 + $0x10] sm:$0xff]   ;;  %p570_p2 = scmp.ne.s32.totalorder %s402_s12, %s569_s13  ;;  %p575_p4 = scmp.lt.s32.totalorder %s569_s13, %s569_s13 }
  0x2a   :  { %467 = vmatpush3.bf16.msra.mxu1 %v496_v3  ;;  %446 = vmatprep.subr.bf16.mxu0 %v497_v4  ;;  %v504_v11 = vld [vmem:[#allocation5 + $0x90] sm:$0xff]   ;;  %v505_v12 = vld [vmem:[#allocation5 + $0x58] sm:$0xff]   ;;  %v509_v16 = vld [vmem:[#allocation5 + $0x60] sm:$0xff]  }
  0x2b   :  { %468 = vmatprep.subr.bf16.mxu1 %v498_v5  ;;  %v506_v13 = vld [vmem:[#allocation5 + $0xd8] sm:$0xff]   ;;  %v510_v17 = vld [vmem:[#allocation5 + $0xe0] sm:$0xff]   ;;  %v513_v20 = vld [vmem:[#allocation5 + $0x68] sm:$0xff]   ;;  %p576_p5 = por %p575_p4, %p574_p3 }
  0x2c   :  { %v507_v14 = vld [vmem:[#allocation5 + $0x18] sm:$0xff]   ;;  %v511_v18 = vld [vmem:[#allocation5 + $0x20] sm:$0xff]   ;;  %v514_v21 = vld [vmem:[#allocation5 + $0xe8] sm:$0xff]  }
  0x2d   :  { %447 = vmatpush3.bf16.msra.mxu0 %v499_v6  ;;  %v508_v15 = vld [vmem:[#allocation5 + $0x98] sm:$0xff]   ;;  %v512_v19 = vld [vmem:[#allocation5 + $0xa0] sm:$0xff]   ;;  %v515_v22 = vld [vmem:[#allocation5 + $0x28] sm:$0xff]   ;;  %p577_p6 = pnand %p576_p5, %p570_p2 }
  0x2e   :  { %469 = vmatpush3.bf16.msra.mxu1 %v500_v7  ;;  %448 = vmatprep.subr.bf16.mxu0 %v501_v8  ;;  %v516_v23 = vld [vmem:[#allocation5 + $0xa8] sm:$0xff]   ;;  %v517_v24 = vld [vmem:[#allocation5 + $0x70] sm:$0xff]   ;;  %v521_v28 = vld [vmem:[#allocation5 + $0x78] sm:$0xff]  }
  0x2f   :  { %470 = vmatprep.subr.bf16.mxu1 %v502_v9  ;;  %v518_v25 = vld [vmem:[#allocation5 + $0xf0] sm:$0xff]   ;;  %v522_v29 = vld [vmem:[#allocation5 + $0xf8] sm:$0xff]   ;;  %v43_v32 = vld [vmem:[#allocation2 + $0x8] sm:$0xff] }
  0x30   :  { %v519_v26 = vld [vmem:[#allocation5 + $0x30] sm:$0xff]   ;;  %v523_v30 = vld [vmem:[#allocation5 + $0x38] sm:$0xff]   ;;  %v42_v34 = vld [vmem:[#allocation2] sm:$0xff]  ;;  %v47_v35 = vpack.c.bf16 %v43_v32, %v43_v32 }
  0x31   :  { %449 = vmatpush3.bf16.msra.mxu0 %v503_v10  ;;  %v520_v27 = vld [vmem:[#allocation5 + $0xb0] sm:$0xff]   ;;  %v524_v31 = vld [vmem:[#allocation5 + $0xb8] sm:$0xff]   ;;  %v46_v37 = vpack.c.bf16 %v42_v34, %v42_v34  ;;  %v411_v42 = vld [vmem:[%s670_s2] ss:$0 sm:$0xff] }
  0x32   :  { %471 = vmatpush3.bf16.msra.mxu1 %v504_v11  ;;  %450 = vmatprep.subr.bf16.mxu0 %v505_v12  ;;  %v45_v33 = vld [vmem:[#allocation2 + $0x18] sm:$0xff]  ;;  %v44_v38 = vld [vmem:[#allocation2 + $0x10] sm:$0xff] }
  0x33   :  { %472 = vmatprep.subr.bf16.mxu1 %v506_v13  ;;  %v49_v36 = vpack.c.bf16 %v45_v33, %v45_v33  ;;  %v48_v39 = vpack.c.bf16 %v44_v38, %v44_v38  ;;  %345 = vmatprep.mubr.bf16.mxu0 %v47_v35 }
  0x35   :  { %451 = vmatpush3.bf16.msra.mxu0 %v507_v14  ;;  %385 = vmatprep.mubr.bf16.mxu1 %v49_v36 }
  0x36   :  { %473 = vmatpush3.bf16.msra.mxu1 %v508_v15  ;;  %452 = vmatprep.subr.bf16.mxu0 %v509_v16 }
  0x37   :  { %474 = vmatprep.subr.bf16.mxu1 %v510_v17 }
  0x39   :  { %453 = vmatpush3.bf16.msra.mxu0 %v511_v18 }
  0x3a   :  { %475 = vmatpush3.bf16.msra.mxu1 %v512_v19  ;;  %454 = vmatprep.subr.bf16.mxu0 %v513_v20 }
  0x3b   :  { %476 = vmatprep.subr.bf16.mxu1 %v514_v21 }
  0x3d   :  { %455 = vmatpush3.bf16.msra.mxu0 %v515_v22 }
  0x3e   :  { %477 = vmatpush3.bf16.msra.mxu1 %v516_v23  ;;  %456 = vmatprep.subr.bf16.mxu0 %v517_v24 }
  0x3f   :  { %478 = vmatprep.subr.bf16.mxu1 %v518_v25 }
  0x41   :  { %457 = vmatpush3.bf16.msra.mxu0 %v519_v26 }
  0x42   :  { %479 = vmatpush3.bf16.msra.mxu1 %v520_v27  ;;  %458 = vmatprep.subr.bf16.mxu0 %v521_v28 }
  0x43   :  { %480 = vmatprep.subr.bf16.mxu1 %v522_v29 }
  0x45   :  { %459 = vmatpush3.bf16.msra.mxu0 %v523_v30 }
  0x46   :  { %481 = vmatpush3.bf16.msra.mxu1 %v524_v31 }
  0x48   :  { %346 = vmatmul.mubr.bf16.vlgmr.msra.gmra.mrb[0].mxu0 %v46_v37 }
  0x49   :  { %386 = vmatmul.mubr.bf16.vlgmr.msra.gmra.mrb[0].mxu1 %v48_v39 }
 0x11b   :  { %v460_v40 = vpop.f32.mrb[0].mxu0 }
 0x11c   :  { %v482_v41 = vpop.f32.mrb[0].mxu1  ;;  %v461_v43 = vpop.f32.mrb[1].mxu0 }
 0x11d   :  { %v483_v44 = vpop.f32.mrb[1].mxu1  ;;  %v462_v45 = vadd.f32 %v461_v43, %v460_v40  ;;  %v463_v47 = vpop.f32.mrb[2].mxu0 }
 0x11e   :  { %v484_v46 = vadd.f32 %v483_v44, %v482_v41  ;;  %v485_v48 = vpop.f32.mrb[2].mxu1  ;;  %v464_v49 = vpop.f32.mrb[3].mxu0 }
 0x11f   :  { %v486_v50 = vpop.f32.mrb[3].mxu1  ;;  %v348_v51 = vadd.f32 %v462_v45, %v411_v42 }
 0x121   :  { %v388_v52 = vadd.f32 %v484_v46, %v348_v51 }
 0x123   :  { %v393_v53 = vpack.c.bf16 %v388_v52, %v388_v52 }
 0x125   :  { %394 = vst [vmem:[#allocation7] sm:$0xf] %v393_v53 }
 0x126   :  { %580 = shalt.err (!%p577_p6)
}
 0x127   :  { %s581_s15 = scalar_lea.hbm %s671_s3, 64 }
 0x128   :  { %p582_p7 = scmp.ne.s32.totalorder %s671_s3, %s581_s15  ;;  %p585_p8 = scmp.lt.u32.totalorder %s581_s15, %s671_s3 }
 0x12a   :  { %p587_p9 = pnand %p585_p8, %p582_p7 }
 0x12c   :  { %590 = shalt.err (!%p587_p9)
}
 0x12d   :  { %404 = dma.vmem_to_hbm [thread:$0]  %s402_s12, 64, %s671_s3, [#allocation4]  }
 0x12e   :  { %595 = dma.done.wait [#allocation4], 64  }
 0x12f   :  { %596 = vsyncadd [#allocation4], 4294967232 }
 0x130   :  { %408 = vsyncpa [#allocation3], 1 }
 0x131   :  { %409 = vsyncpa [#allocation6], 1 }
 0x132   :  { %410 = vsyncpa [#allocation4], 1 }

</bundles_post_ra>
